<compile_context>
chip_gen: v7x
topology: tpu7x:2x2x1
jax: 0.10.0
libtpu: 0.0.40
codegen_flags: <defaults>
</compile_context>

<pallas_src>
import jax
import jax.numpy as jnp
import numpy as np
from jax.experimental import pallas as pl
from jax.experimental.pallas import tpu as pltpu

NEG_SLOPE = 0.01   # torch.nn.LeakyReLU default
HPAD = 128         # padded hidden / output lane width
MAX_TB = 1024      # batch tile: mult. of 256 (v6e MXU) and 128 (v5e MXU); ~14 MiB VMEM w/ dbl-buffer


def _round_up(n, m):
    return ((n + m - 1) // m) * m


def _leaky_relu(x):
    return jnp.where(x > 0, x, NEG_SLOPE * x)


def linearnet_kernel(x_ref, w1_ref, b1_ref, w2_ref, b2_ref, w3_ref, b3_ref, o_ref):
    # Layer 1: (TB, Dpad) @ (Dpad, 128) on the MXU, f32 accumulate.
    h1 = jnp.dot(x_ref[...], w1_ref[...], preferred_element_type=jnp.float32)
    h1 = _leaky_relu(h1 + b1_ref[...])
    # dropout(p=0.0) is identity — nothing to do.

    # Layers 2/3: real hidden width is 2 -> VPU broadcast-FMA instead of padded MXU matmuls.
    # h2[:, j] = leaky(h1[:,0]*w2[0,j] + h1[:,1]*w2[1,j] + b2[j]); lanes j>=2 stay exactly 0.
    w2 = w2_ref[...]
    h2 = _leaky_relu(h1[:, 0:1] * w2[0:1, :] + h1[:, 1:2] * w2[1:2, :] + b2_ref[...])

    w3 = w3_ref[...]
    h3 = _leaky_relu(h2[:, 0:1] * w3[0:1, :] + h2[:, 1:2] * w3[1:2, :] + b3_ref[...])

    o_ref[...] = h3.astype(o_ref.dtype)


def make_params(key, in_channels=1316, n_classes=1):
    """Deterministic PyTorch-Linear-style init (uniform(-1/sqrt(fan_in), 1/sqrt(fan_in)))."""
    ks = jax.random.split(key, 6)

    def lin(kw, kb, fan_in, fan_out):
        bound = 1.0 / np.sqrt(fan_in)
        w = jax.random.uniform(kw, (fan_in, fan_out), jnp.float32, -bound, bound)
        b = jax.random.uniform(kb, (fan_out,), jnp.float32, -bound, bound)
        return w, b

    w1, b1 = lin(ks[0], ks[1], in_channels, 2)
    w2, b2 = lin(ks[2], ks[3], 2, 2)
    w3, b3 = lin(ks[4], ks[5], 2, n_classes)
    return (w1, b1), (w2, b2), (w3, b3)


def prepare_params(params):
    """One-time padding of weights to TPU-friendly layouts (hoisted out of the forward pass)."""
    (w1, b1), (w2, b2), (w3, b3) = params
    in_features, h1 = w1.shape
    n_classes = w3.shape[1]
    d_pad = _round_up(in_features, 128)

    w1p = jnp.zeros((d_pad, HPAD), jnp.float32).at[:in_features, :h1].set(w1)
    b1p = jnp.zeros((1, HPAD), jnp.float32).at[0, :h1].set(b1)
    w2r = jnp.zeros((8, HPAD), jnp.float32).at[:w2.shape[0], :w2.shape[1]].set(w2)
    b2p = jnp.zeros((1, HPAD), jnp.float32).at[0, :b2.shape[0]].set(b2)
    w3r = jnp.zeros((8, HPAD), jnp.float32).at[:w3.shape[0], :w3.shape[1]].set(w3)
    b3p = jnp.zeros((1, HPAD), jnp.float32).at[0, :b3.shape[0]].set(b3)
    return (w1p, b1p, w2r, b2p, w3r, b3p, n_classes, in_features)


def linearnet_forward(x, prepared, clinical=None):
    w1p, b1p, w2r, b2p, w3r, b3p, n_classes, in_features = prepared

    # glue: flatten + optional clinical concat (matches torch.flatten(start_dim=1) + cat)
    if x.ndim > 2:
        x = x.reshape(x.shape[0], -1)
    if clinical is not None:
        x = jnp.concatenate([x, clinical], axis=1)
    x = x.astype(jnp.float32)
    B, D = x.shape
    assert D == in_features, (D, in_features)

    d_pad = w1p.shape[0]
    tb = min(MAX_TB, _round_up(max(B, 1), 8))
    b_pad = _round_up(B, tb)
    # zero-pad batch tail + feature tail (extra columns hit zero weight rows -> exact)
    xp = jnp.zeros((b_pad, d_pad), jnp.float32).at[:B, :D].set(x)

    const = lambda i: (0, 0)   # weights/biases: same block every step -> DMA once, VMEM-resident
    out = pl.pallas_call(
        linearnet_kernel,
        out_shape=jax.ShapeDtypeStruct((b_pad, HPAD), jnp.float32),
        grid=(b_pad // tb,),
        in_specs=[
            pl.BlockSpec((tb, d_pad), lambda i: (i, 0)),   # x: streamed per batch tile
            pl.BlockSpec((d_pad, HPAD), const),            # w1 (padded)
            pl.BlockSpec((1, HPAD), const),                # b1
            pl.BlockSpec((8, HPAD), const),                # w2 rows (padded)
            pl.BlockSpec((1, HPAD), const),                # b2
            pl.BlockSpec((8, HPAD), const),                # w3 rows (padded)
            pl.BlockSpec((1, HPAD), const),                # b3
        ],
        out_specs=pl.BlockSpec((tb, HPAD), lambda i: (i, 0)),
        compiler_params=pltpu.CompilerParams(
            dimension_semantics=("parallel",),      # shard batch tiles across v7x's 2 TCs
            vmem_limit_bytes=48 * 1024 * 1024,      # headroom for TB=1024 dbl-buffer; safe on v7x 64 MiB
        ),
    )(xp, w1p, b1p, w2r, b2p, w3r, b3p)

    out = out[:B, :n_classes]  # drop batch-tail + lane padding

    # torch tail: if len(x)==1 -> squeeze().unsqueeze(0) ; else -> squeeze()
    if B == 1:
        out = out.reshape(1) if n_classes == 1 else out
    else:
        out = jnp.squeeze(out)
    return out


def _reference(x, params, clinical=None):
    (w1, b1), (w2, b2), (w3, b3) = params
    if x.ndim > 2:
        x = x.reshape(x.shape[0], -1)
    if clinical is not None:
        x = jnp.concatenate([x, clinical], axis=1)
    h = _leaky_relu(x @ w1 + b1)
    h = _leaky_relu(h @ w2 + b2)
    h = _leaky_relu(h @ w3 + b3)
    if x.shape[0] == 1:
        return h.reshape(1) if h.size == 1 else h
    return jnp.squeeze(h)


if __name__ == "__main__":
    in_channels = 1316
    n_classes = 1
    B = 4

    key = jax.random.PRNGKey(0)
    kx, kp = jax.random.split(key)
    x = jax.random.normal(kx, (B, in_channels), jnp.float32)
    params = make_params(kp, in_channels=in_channels, n_classes=n_classes)
    prepared = prepare_params(params)   # one-time weight padding (hoisted out of forward)

    out = linearnet_forward(x, prepared)
    out = jax.block_until_ready(out)

    ref = _reference(x, params)
    assert out.shape == ref.shape, (out.shape, ref.shape)
    np.testing.assert_allclose(np.asarray(out), np.asarray(ref), rtol=1e-5, atol=1e-5)

    print("KERNEL_OK")
</pallas_src>

<mosaic_0001>
module attributes {stable_mosaic.version = 11 : i64} {
  func.func @linearnet_kernel(%arg0: i32, %arg1: memref<8x1408xf32, #tpu.memory_space<vmem>>, %arg2: memref<1408x128xf32, #tpu.memory_space<vmem>>, %arg3: memref<1x128xf32, #tpu.memory_space<vmem>>, %arg4: memref<8x128xf32, #tpu.memory_space<vmem>>, %arg5: memref<1x128xf32, #tpu.memory_space<vmem>>, %arg6: memref<8x128xf32, #tpu.memory_space<vmem>>, %arg7: memref<1x128xf32, #tpu.memory_space<vmem>>, %arg8: memref<8x128xf32, #tpu.memory_space<vmem>>) attributes {dimension_semantics = [#tpu.dimension_semantics<parallel>], iteration_bounds = array<i64: 1>, scalar_prefetch = 0 : i64, scratch_operands = 0 : i64, tpu.core_type = #tpu.core_type<tc>, window_params = [{transform_indices = @transform_0, window_bounds = array<i64: 8, 1408>}, {pipeline_mode = #tpu.pipeline_mode<synchronous>, transform_indices = @transform_1, window_bounds = array<i64: 1408, 128>}, {pipeline_mode = #tpu.pipeline_mode<synchronous>, transform_indices = @transform_2, window_bounds = array<i64: 1, 128>}, {pipeline_mode = #tpu.pipeline_mode<synchronous>, transform_indices = @transform_3, window_bounds = array<i64: 8, 128>}, {pipeline_mode = #tpu.pipeline_mode<synchronous>, transform_indices = @transform_4, window_bounds = array<i64: 1, 128>}, {pipeline_mode = #tpu.pipeline_mode<synchronous>, transform_indices = @transform_5, window_bounds = array<i64: 8, 128>}, {pipeline_mode = #tpu.pipeline_mode<synchronous>, transform_indices = @transform_6, window_bounds = array<i64: 1, 128>}, {transform_indices = @transform_7, window_bounds = array<i64: 8, 128>}]} {
    %c0 = arith.constant 0 : index
    %c0_0 = arith.constant 0 : index
    %0 = vector.load %arg1[%c0, %c0_0] : memref<8x1408xf32, #tpu.memory_space<vmem>>, vector<8x1408xf32>
    %c0_1 = arith.constant 0 : index
    %c0_2 = arith.constant 0 : index
    %1 = vector.load %arg2[%c0_1, %c0_2] : memref<1408x128xf32, #tpu.memory_space<vmem>>, vector<1408x128xf32>
    %cst = arith.constant dense<0.000000e+00> : vector<8x128xf32>
    %2 = tpu.matmul %0, %1, %cst {dimension_numbers = #tpu.dot_dimension_numbers<[1], [0], [0], [1], [0, 0, 1, 1], [], []>} : vector<8x1408xf32>, vector<1408x128xf32>, vector<8x128xf32> -> vector<8x128xf32>
    %c0_3 = arith.constant 0 : index
    %c0_4 = arith.constant 0 : index
    %3 = vector.load %arg3[%c0_3, %c0_4] : memref<1x128xf32, #tpu.memory_space<vmem>>, vector<1x128xf32>
    %4 = vector.broadcast %3 : vector<1x128xf32> to vector<8x128xf32>
    %5 = arith.addf %2, %4 : vector<8x128xf32>
    %cst_5 = arith.constant 0.000000e+00 : f32
    %6 = vector.broadcast %cst_5 : f32 to vector<8x128xf32>
    %7 = arith.cmpf ogt, %5, %6 : vector<8x128xf32>
    %cst_6 = arith.constant 0.00999999977 : f32
    %8 = vector.broadcast %cst_6 : f32 to vector<8x128xf32>
    %9 = arith.mulf %8, %5 : vector<8x128xf32>
    %10 = arith.select %7, %5, %9 : vector<8x128xi1>, vector<8x128xf32>
    %c0_7 = arith.constant 0 : index
    %c0_8 = arith.constant 0 : index
    %11 = vector.load %arg4[%c0_7, %c0_8] : memref<8x128xf32, #tpu.memory_space<vmem>>, vector<8x128xf32>
    %12 = vector.extract_strided_slice %10 {offsets = [0, 0], sizes = [8, 1], strides = [1, 1]} : vector<8x128xf32> to vector<8x1xf32>
    %13 = vector.extract_strided_slice %11 {offsets = [0, 0], sizes = [1, 128], strides = [1, 1]} : vector<8x128xf32> to vector<1x128xf32>
    %14 = vector.broadcast %12 : vector<8x1xf32> to vector<8x128xf32>
    %15 = vector.broadcast %13 : vector<1x128xf32> to vector<8x128xf32>
    %16 = arith.mulf %14, %15 : vector<8x128xf32>
    %17 = vector.extract_strided_slice %10 {offsets = [0, 1], sizes = [8, 1], strides = [1, 1]} : vector<8x128xf32> to vector<8x1xf32>
    %18 = vector.extract_strided_slice %11 {offsets = [1, 0], sizes = [1, 128], strides = [1, 1]} : vector<8x128xf32> to vector<1x128xf32>
    %19 = vector.broadcast %17 : vector<8x1xf32> to vector<8x128xf32>
    %20 = vector.broadcast %18 : vector<1x128xf32> to vector<8x128xf32>
    %21 = arith.mulf %19, %20 : vector<8x128xf32>
    %22 = arith.addf %16, %21 : vector<8x128xf32>
    %c0_9 = arith.constant 0 : index
    %c0_10 = arith.constant 0 : index
    %23 = vector.load %arg5[%c0_9, %c0_10] : memref<1x128xf32, #tpu.memory_space<vmem>>, vector<1x128xf32>
    %24 = vector.broadcast %23 : vector<1x128xf32> to vector<8x128xf32>
    %25 = arith.addf %22, %24 : vector<8x128xf32>
    %cst_11 = arith.constant 0.000000e+00 : f32
    %26 = vector.broadcast %cst_11 : f32 to vector<8x128xf32>
    %27 = arith.cmpf ogt, %25, %26 : vector<8x128xf32>
    %cst_12 = arith.constant 0.00999999977 : f32
    %28 = vector.broadcast %cst_12 : f32 to vector<8x128xf32>
    %29 = arith.mulf %28, %25 : vector<8x128xf32>
    %30 = arith.select %27, %25, %29 : vector<8x128xi1>, vector<8x128xf32>
    %c0_13 = arith.constant 0 : index
    %c0_14 = arith.constant 0 : index
    %31 = vector.load %arg6[%c0_13, %c0_14] : memref<8x128xf32, #tpu.memory_space<vmem>>, vector<8x128xf32>
    %32 = vector.extract_strided_slice %30 {offsets = [0, 0], sizes = [8, 1], strides = [1, 1]} : vector<8x128xf32> to vector<8x1xf32>
    %33 = vector.extract_strided_slice %31 {offsets = [0, 0], sizes = [1, 128], strides = [1, 1]} : vector<8x128xf32> to vector<1x128xf32>
    %34 = vector.broadcast %32 : vector<8x1xf32> to vector<8x128xf32>
    %35 = vector.broadcast %33 : vector<1x128xf32> to vector<8x128xf32>
    %36 = arith.mulf %34, %35 : vector<8x128xf32>
    %37 = vector.extract_strided_slice %30 {offsets = [0, 1], sizes = [8, 1], strides = [1, 1]} : vector<8x128xf32> to vector<8x1xf32>
    %38 = vector.extract_strided_slice %31 {offsets = [1, 0], sizes = [1, 128], strides = [1, 1]} : vector<8x128xf32> to vector<1x128xf32>
    %39 = vector.broadcast %37 : vector<8x1xf32> to vector<8x128xf32>
    %40 = vector.broadcast %38 : vector<1x128xf32> to vector<8x128xf32>
    %41 = arith.mulf %39, %40 : vector<8x128xf32>
    %42 = arith.addf %36, %41 : vector<8x128xf32>
    %c0_15 = arith.constant 0 : index
    %c0_16 = arith.constant 0 : index
    %43 = vector.load %arg7[%c0_15, %c0_16] : memref<1x128xf32, #tpu.memory_space<vmem>>, vector<1x128xf32>
    %44 = vector.broadcast %43 : vector<1x128xf32> to vector<8x128xf32>
    %45 = arith.addf %42, %44 : vector<8x128xf32>
    %cst_17 = arith.constant 0.000000e+00 : f32
    %46 = vector.broadcast %cst_17 : f32 to vector<8x128xf32>
    %47 = arith.cmpf ogt, %45, %46 : vector<8x128xf32>
    %cst_18 = arith.constant 0.00999999977 : f32
    %48 = vector.broadcast %cst_18 : f32 to vector<8x128xf32>
    %49 = arith.mulf %48, %45 : vector<8x128xf32>
    %50 = arith.select %47, %45, %49 : vector<8x128xi1>, vector<8x128xf32>
    %c0_19 = arith.constant 0 : index
    %c0_20 = arith.constant 0 : index
    %51 = vector.load %arg8[%c0_19, %c0_20] : memref<8x128xf32, #tpu.memory_space<vmem>>, vector<8x128xf32>
    tpu.vector_store %arg8[%c0_19, %c0_20], %50 {strides = array<i32>} : memref<8x128xf32, #tpu.memory_space<vmem>>, vector<8x128xf32>,
    return
  }
  func.func @transform_0(%arg0: i32) -> (i32, i32) {
    %c0_i32 = arith.constant 0 : i32
    %c0_i32_0 = arith.constant 0 : i32
    return %arg0, %c0_i32 : i32, i32
  }
  func.func @transform_1(%arg0: i32) -> (i32, i32) {
    %c0_i32 = arith.constant 0 : i32
    %c0_i32_0 = arith.constant 0 : i32
    %c0_i32_1 = arith.constant 0 : i32
    return %c0_i32, %c0_i32_0 : i32, i32
  }
  func.func @transform_2(%arg0: i32) -> (i32, i32) {
    %c0_i32 = arith.constant 0 : i32
    %c0_i32_0 = arith.constant 0 : i32
    %c0_i32_1 = arith.constant 0 : i32
    return %c0_i32, %c0_i32_0 : i32, i32
  }
  func.func @transform_3(%arg0: i32) -> (i32, i32) {
    %c0_i32 = arith.constant 0 : i32
    %c0_i32_0 = arith.constant 0 : i32
    %c0_i32_1 = arith.constant 0 : i32
    return %c0_i32, %c0_i32_0 : i32, i32
  }
  func.func @transform_4(%arg0: i32) -> (i32, i32) {
    %c0_i32 = arith.constant 0 : i32
    %c0_i32_0 = arith.constant 0 : i32
    %c0_i32_1 = arith.constant 0 : i32
    return %c0_i32, %c0_i32_0 : i32, i32
  }
  func.func @transform_5(%arg0: i32) -> (i32, i32) {
    %c0_i32 = arith.constant 0 : i32
    %c0_i32_0 = arith.constant 0 : i32
    %c0_i32_1 = arith.constant 0 : i32
    return %c0_i32, %c0_i32_0 : i32, i32
  }
  func.func @transform_6(%arg0: i32) -> (i32, i32) {
    %c0_i32 = arith.constant 0 : i32
    %c0_i32_0 = arith.constant 0 : i32
    %c0_i32_1 = arith.constant 0 : i32
    return %c0_i32, %c0_i32_0 : i32, i32
  }
  func.func @transform_7(%arg0: i32) -> (i32, i32) {
    %c0_i32 = arith.constant 0 : i32
    %c0_i32_0 = arith.constant 0 : i32
    return %arg0, %c0_i32 : i32, i32
  }
}

</mosaic_0001>

<bundles_post_ra>
// kernel: tpu_custom_call.1
= control target key start
LH: loop header
LB: loop body
LE: loop exit
PB: predicated region body
PF: predicated region fallthrough
CT: control target
= control target key end

     0   :  { %12 = vsyncpa [#allocation3], 0  ;;  %s1367_s0 = inlined_call_operand.hbm [shape: f32[8,1408], index: 0, kind: input, shape index: {}]   ;;  %s1368_s1 = inlined_call_operand.hbm [shape: f32[1408,128], index: 1, kind: input, shape index: {}]   ;;  %s1369_s2 = inlined_call_operand.vmem [shape: f32[1,128], index: 2, kind: input, shape index: {}]   ;;  %s1370_s3 = inlined_call_operand.vmem [shape: f32[8,128], index: 3, kind: input, shape index: {}]   ;;  %s1371_s4 = inlined_call_operand.vmem [shape: f32[1,128], index: 4, kind: input, shape index: {}]   ;;  %s1372_s5 = inlined_call_operand.vmem [shape: f32[8,128], index: 5, kind: input, shape index: {}]   ;;  %s1373_s6 = inlined_call_operand.vmem [shape: f32[1,128], index: 6, kind: input, shape index: {}]   ;;  %s1374_s7 = inlined_call_operand.hbm [shape: f32[8,128], index: 7, kind: output, shape index: {}]  }
   0x1   :  { %13 = vsyncpa [#allocation6], 0 }
   0x2   :  { %14 = vsyncpa [#allocation4], 0  ;;  %s1251_s24 = smov [#allocation2]   ;;  %s1252_s26 = smov [#allocation5]  }
   0x3   :  { %s21_s25 = sshll.u32 %s1251_s24, 4  ;;  %s30_s27 = sshll.u32 %s1252_s26, 4  ;;  %s22_s25 = int_to_ptr.vmem [resolvable:$true] %s21_s25  ;;  %s1301_s27 = int_to_ptr.vmem [resolvable:$true] %s30_s27 }
   0x4   :  { %s1179_s30 = scalar_lea.hbm %s1367_s0, 1408 }
   0x5   :  { %p1180_p0 = scmp.ne.s32.totalorder %s1367_s0, %s1179_s30  ;;  %p1183_p1 = scmp.lt.u32.totalorder %s1179_s30, %s1367_s0 }
   0x7   :  { %p1185_p2 = pnand %p1183_p1, %p1180_p0 }
   0x9   :  { %1188 = shalt.err (!%p1185_p2)
}
   0xa   :  { %s1189_s12 = scalar_lea.vmem %s22_s25, 1408  ;;  %p1194_p4 = scmp.lt.s32.totalorder %s22_s25, %s22_s25 }
   0xb   :  { %p1190_p3 = scmp.ne.s32.totalorder %s22_s25, %s1189_s12  ;;  %p1195_p5 = scmp.lt.s32.totalorder %s1189_s12, %s1189_s12 }
   0xd   :  { %p1196_p6 = por %p1195_p5, %p1194_p4 }
   0xf   :  { %p1197_p7 = pnand %p1196_p6, %p1190_p3 }
  0x11   :  { %1200 = shalt.err (!%p1197_p7)
}
  0x12   :  { %24 = dma.hbm_to_vmem [thread:$0]  %s1367_s0, 1408, %s22_s25, [#allocation3]  }
  0x13   :  { %s1201_s17 = scalar_lea.hbm %s1368_s1, 22528 }
  0x14   :  { %p1202_p8 = scmp.ne.s32.totalorder %s1368_s1, %s1201_s17  ;;  %p1205_p9 = scmp.lt.u32.totalorder %s1201_s17, %s1368_s1 }
  0x16   :  { %p1207_p10 = pnand %p1205_p9, %p1202_p8 }
  0x18   :  { %1210 = shalt.err (!%p1207_p10)
}
  0x19   :  { %s1211_s22 = scalar_lea.vmem %s1301_s27, 22528  ;;  %p1216_p12 = scmp.lt.s32.totalorder %s1301_s27, %s1301_s27 }
  0x1a   :  { %p1212_p11 = scmp.ne.s32.totalorder %s1301_s27, %s1211_s22  ;;  %p1217_p13 = scmp.lt.s32.totalorder %s1211_s22, %s1211_s22 }
  0x1c   :  { %p1218_p0 = por %p1217_p13, %p1216_p12 }
  0x1e   :  { %p1219_p1 = pnand %p1218_p0, %p1212_p11 }
  0x20   :  { %1222 = shalt.err (!%p1219_p1)
}
  0x21   :  { %s1253_s0 = smov 128   ;;  %s1254_s23 = smov 8  }
  0x22   :  { %36 = dma.hbm_to_vmem [thread:$0]  %s1368_s1, 22528, %s1301_s27, [#allocation6], %s1253_s0, %s1253_s0, %s1254_s23  }
  0x23   :  { %1245 = dma.done.wait [#allocation3], 1408  }
  0x24   :  { %1246 = vsyncadd [#allocation3], 4294965888 }
  0x25   :  { %1247 = dma.done.wait [#allocation6], 22528  }
  0x26   :  { %1248 = vsyncadd [#allocation6], 4294944768  ;;  %v80_v0 = vld [vmem:[#allocation5 + $0x80] sm:$0xff]  ;;  %v81_v1 = vld [vmem:[#allocation5 + $0x88] sm:$0xff]  ;;  %vm1256_vm0 = vmmov 0   ;;  %s1260_s9 = smov [#allocation7]  }
  0x27   :  { %v64_v2 = vld [vmem:[#allocation5] sm:$0xff]  ;;  %v981_v3 = vpack.c.bf16 %v81_v1, %v80_v0  ;;  %v65_v4 = vld [vmem:[#allocation5 + $0x8] sm:$0xff]  ;;  %v82_v11 = vld [vmem:[#allocation5 + $0x90] sm:$0xff]  ;;  %s741_s10 = sshll.u32 %s1260_s9, 4  ;;  %s742_s10 = int_to_ptr.vmem [resolvable:$true] %s741_s10 }
  0x28   :  { %v112_v5 = vld [vmem:[#allocation5 + $0x180] sm:$0xff]  ;;  %v113_v6 = vld [vmem:[#allocation5 + $0x188] sm:$0xff]  ;;  %v983_v7 = vpack.c.bf16 %v65_v4, %v64_v2  ;;  %v83_v13 = vld [vmem:[#allocation5 + $0x98] sm:$0xff]  ;;  %p1228_p3 = scmp.lt.s32.totalorder %s742_s10, %s742_s10 }
  0x29   :  { %v1013_v8 = vpack.c.bf16 %v113_v6, %v112_v5  ;;  %v96_v9 = vld [vmem:[#allocation5 + $0x100] sm:$0xff]  ;;  %v97_v10 = vld [vmem:[#allocation5 + $0x108] sm:$0xff]  ;;  %982 = vmatprep.subr.bf16.mxu0 %v981_v3  ;;  %v66_v14 = vld [vmem:[#allocation5 + $0x10] sm:$0xff]  ;;  %v985_v16 = vpack.c.bf16 %v83_v13, %v82_v11 }
  0x2a   :  { %v1015_v12 = vpack.c.bf16 %v97_v10, %v96_v9  ;;  %v67_v15 = vld [vmem:[#allocation5 + $0x18] sm:$0xff]  ;;  %984 = vmatpush3.bf16.msra.mxu0 %v983_v7  ;;  %v114_v18 = vld [vmem:[#allocation5 + $0x190] sm:$0xff]  ;;  %v84_v23 = vld [vmem:[#allocation5 + $0xa0] sm:$0xff] }
  0x2b   :  { %1014 = vmatprep.subr.bf16.mxu1 %v1013_v8  ;;  %v987_v17 = vpack.c.bf16 %v67_v15, %v66_v14  ;;  %v115_v19 = vld [vmem:[#allocation5 + $0x198] sm:$0xff]  ;;  %v98_v20 = vld [vmem:[#allocation5 + $0x110] sm:$0xff]  ;;  %v85_v24 = vld [vmem:[#allocation5 + $0xa8] sm:$0xff]  ;;  %986 = vmatprep.subr.bf16.mxu0 %v985_v16 }
  0x2c   :  { %1016 = vmatpush3.bf16.msra.mxu1 %v1015_v12  ;;  %v1017_v21 = vpack.c.bf16 %v115_v19, %v114_v18  ;;  %v99_v22 = vld [vmem:[#allocation5 + $0x118] sm:$0xff]  ;;  %v989_v26 = vpack.c.bf16 %v85_v24, %v84_v23  ;;  %v68_v27 = vld [vmem:[#allocation5 + $0x20] sm:$0xff]  ;;  %v69_v28 = vld [vmem:[#allocation5 + $0x28] sm:$0xff] }
  0x2d   :  { %v1019_v25 = vpack.c.bf16 %v99_v22, %v98_v20  ;;  %v116_v29 = vld [vmem:[#allocation5 + $0x1a0] sm:$0xff]  ;;  %v117_v30 = vld [vmem:[#allocation5 + $0x1a8] sm:$0xff]  ;;  %v991_v33 = vpack.c.bf16 %v69_v28, %v68_v27  ;;  %v86_v35 = vld [vmem:[#allocation5 + $0xb0] sm:$0xff] }
  0x2e   :  { %1018 = vmatprep.subr.bf16.mxu1 %v1017_v21  ;;  %v100_v31 = vld [vmem:[#allocation5 + $0x120] sm:$0xff]  ;;  %v101_v32 = vld [vmem:[#allocation5 + $0x128] sm:$0xff]  ;;  %988 = vmatpush3.bf16.msra.mxu0 %v987_v17  ;;  %v1021_v34 = vpack.c.bf16 %v117_v30, %v116_v29  ;;  %v87_v36 = vld [vmem:[#allocation5 + $0xb8] sm:$0xff] }
  0x2f   :  { %v70_v37 = vld [vmem:[#allocation5 + $0x30] sm:$0xff]  ;;  %990 = vmatprep.subr.bf16.mxu0 %v989_v26  ;;  %v1023_v38 = vpack.c.bf16 %v101_v32, %v100_v31  ;;  %v993_v39 = vpack.c.bf16 %v87_v36, %v86_v35  ;;  %v71_v40 = vld [vmem:[#allocation5 + $0x38] sm:$0xff]  ;;  %v88_v46 = vld [vmem:[#allocation5 + $0xc0] sm:$0xff] }
  0x30   :  { %1020 = vmatpush3.bf16.msra.mxu1 %v1019_v25  ;;  %v118_v41 = vld [vmem:[#allocation5 + $0x1b0] sm:$0xff]  ;;  %v119_v42 = vld [vmem:[#allocation5 + $0x1b8] sm:$0xff]  ;;  %v89_v47 = vld [vmem:[#allocation5 + $0xc8] sm:$0xff]  ;;  %v995_v48 = vpack.c.bf16 %v71_v40, %v70_v37 }
  0x31   :  { %1022 = vmatprep.subr.bf16.mxu1 %v1021_v34  ;;  %v1025_v43 = vpack.c.bf16 %v119_v42, %v118_v41  ;;  %v102_v44 = vld [vmem:[#allocation5 + $0x130] sm:$0xff]  ;;  %v103_v45 = vld [vmem:[#allocation5 + $0x138] sm:$0xff]  ;;  %v120_v49 = vld [vmem:[#allocation5 + $0x1c0] sm:$0xff]  ;;  %v997_v52 = vpack.c.bf16 %v89_v47, %v88_v46 }
  0x32   :  { %992 = vmatpush3.bf16.msra.mxu0 %v991_v33  ;;  %v121_v50 = vld [vmem:[#allocation5 + $0x1c8] sm:$0xff]  ;;  %v1027_v51 = vpack.c.bf16 %v103_v45, %v102_v44  ;;  %v72_v53 = vld [vmem:[#allocation5 + $0x40] sm:$0xff]  ;;  %v90_v58 = vld [vmem:[#allocation5 + $0xd0] sm:$0xff] }
  0x33   :  { %994 = vmatprep.subr.bf16.mxu0 %v993_v39  ;;  %v73_v54 = vld [vmem:[#allocation5 + $0x48] sm:$0xff]  ;;  %v104_v55 = vld [vmem:[#allocation5 + $0x140] sm:$0xff]  ;;  %v1029_v56 = vpack.c.bf16 %v121_v50, %v120_v49  ;;  %v91_v59 = vld [vmem:[#allocation5 + $0xd8] sm:$0xff] }
  0x34   :  { %1024 = vmatpush3.bf16.msra.mxu1 %v1023_v38  ;;  %v105_v57 = vld [vmem:[#allocation5 + $0x148] sm:$0xff]  ;;  %v122_v60 = vld [vmem:[#allocation5 + $0x1d0] sm:$0xff]  ;;  %v123_v61 = vld [vmem:[#allocation5 + $0x1d8] sm:$0xff]  ;;  %v999_v62 = vpack.c.bf16 %v73_v54, %v72_v53  ;;  %v1001_v0 = vpack.c.bf16 %v91_v59, %v90_v58 }
  0x35   :  { %1026 = vmatprep.subr.bf16.mxu1 %v1025_v43  ;;  %v1031_v63 = vpack.c.bf16 %v105_v57, %v104_v55  ;;  %v74_v1 = vld [vmem:[#allocation5 + $0x50] sm:$0xff]  ;;  %v75_v2 = vld [vmem:[#allocation5 + $0x58] sm:$0xff]  ;;  %v1033_v4 = vpack.c.bf16 %v123_v61, %v122_v60  ;;  %v92_v6 = vld [vmem:[#allocation5 + $0xe0] sm:$0xff] }
  0x36   :  { %996 = vmatpush3.bf16.msra.mxu0 %v995_v48  ;;  %v106_v3 = vld [vmem:[#allocation5 + $0x150] sm:$0xff]  ;;  %v107_v5 = vld [vmem:[#allocation5 + $0x158] sm:$0xff]  ;;  %v93_v7 = vld [vmem:[#allocation5 + $0xe8] sm:$0xff]  ;;  %v1003_v10 = vpack.c.bf16 %v75_v2, %v74_v1 }
  0x37   :  { %998 = vmatprep.subr.bf16.mxu0 %v997_v52  ;;  %v124_v8 = vld [vmem:[#allocation5 + $0x1e0] sm:$0xff]  ;;  %v125_v9 = vld [vmem:[#allocation5 + $0x1e8] sm:$0xff]  ;;  %v54_v12 = vld [vmem:[#allocation2 + $0x8] sm:$0xff]  ;;  %v1035_v13 = vpack.c.bf16 %v107_v5, %v106_v3  ;;  %v1005_v14 = vpack.c.bf16 %v93_v7, %v92_v6 }
  0x38   :  { %1028 = vmatpush3.bf16.msra.mxu1 %v1027_v51  ;;  %v76_v11 = vld [vmem:[#allocation5 + $0x60] sm:$0xff]  ;;  %v77_v15 = vld [vmem:[#allocation5 + $0x68] sm:$0xff]  ;;  %v1037_v18 = vpack.c.bf16 %v125_v9, %v124_v8  ;;  %v94_v19 = vld [vmem:[#allocation5 + $0xf0] sm:$0xff]  ;;  %311 = vmatprep.mubr.f32.mxu0 %v54_v12 }
  0x39   :  { %1030 = vmatprep.subr.bf16.mxu1 %v1029_v56  ;;  %v108_v16 = vld [vmem:[#allocation5 + $0x160] sm:$0xff]  ;;  %v109_v17 = vld [vmem:[#allocation5 + $0x168] sm:$0xff]  ;;  %v95_v20 = vld [vmem:[#allocation5 + $0xf8] sm:$0xff]  ;;  %v1007_v24 = vpack.c.bf16 %v77_v15, %v76_v11 }
  0x3a   :  { %1000 = vmatpush3.bf16.msra.mxu0 %v999_v62  ;;  %v56_v21 = vld [vmem:[#allocation2 + $0x18] sm:$0xff]  ;;  %v126_v22 = vld [vmem:[#allocation5 + $0x1f0] sm:$0xff]  ;;  %v127_v23 = vld [vmem:[#allocation5 + $0x1f8] sm:$0xff]  ;;  %v1039_v25 = vpack.c.bf16 %v109_v17, %v108_v16  ;;  %v1009_v26 = vpack.c.bf16 %v95_v20, %v94_v19 }
  0x3b   :  { %1002 = vmatprep.subr.bf16.mxu0 %v1001_v0  ;;  %381 = vmatprep.mubr.f32.mxu1 %v56_v21  ;;  %v78_v27 = vld [vmem:[#allocation5 + $0x70] sm:$0xff]  ;;  %v79_v28 = vld [vmem:[#allocation5 + $0x78] sm:$0xff]  ;;  %v1041_v30 = vpack.c.bf16 %v127_v23, %v126_v22  ;;  %v144_v32 = vld [vmem:[#allocation5 + $0x280] sm:$0xff] }
  0x3c   :  { %1032 = vmatpush3.bf16.msra.mxu1 %v1031_v63  ;;  %v110_v29 = vld [vmem:[#allocation5 + $0x170] sm:$0xff]  ;;  %v111_v31 = vld [vmem:[#allocation5 + $0x178] sm:$0xff]  ;;  %v145_v33 = vld [vmem:[#allocation5 + $0x288] sm:$0xff]  ;;  %v1011_v36 = vpack.c.bf16 %v79_v28, %v78_v27 }
  0x3d   :  { %1034 = vmatprep.subr.bf16.mxu1 %v1033_v4  ;;  %v176_v34 = vld [vmem:[#allocation5 + $0x380] sm:$0xff]  ;;  %v177_v35 = vld [vmem:[#allocation5 + $0x388] sm:$0xff]  ;;  %v1043_v37 = vpack.c.bf16 %v111_v31, %v110_v29  ;;  %v1045_v38 = vpack.c.bf16 %v145_v33, %v144_v32  ;;  %v146_v44 = vld [vmem:[#allocation5 + $0x290] sm:$0xff] }
  0x3e   :  { %1004 = vmatpush3.bf16.msra.mxu0 %v1003_v10  ;;  %v128_v39 = vld [vmem:[#allocation5 + $0x200] sm:$0xff]  ;;  %v129_v40 = vld [vmem:[#allocation5 + $0x208] sm:$0xff]  ;;  %v1077_v42 = vpack.c.bf16 %v177_v35, %v176_v34  ;;  %v147_v45 = vld [vmem:[#allocation5 + $0x298] sm:$0xff] }
  0x3f   :  { %1006 = vmatprep.subr.bf16.mxu0 %v1005_v14  ;;  %v160_v41 = vld [vmem:[#allocation5 + $0x300] sm:$0xff]  ;;  %v161_v43 = vld [vmem:[#allocation5 + $0x308] sm:$0xff]  ;;  %v178_v46 = vld [vmem:[#allocation5 + $0x390] sm:$0xff]  ;;  %v1047_v49 = vpack.c.bf16 %v129_v40, %v128_v39  ;;  %v1049_v52 = vpack.c.bf16 %v147_v45, %v146_v44 }
  0x40   :  { %1036 = vmatpush3.bf16.msra.mxu1 %v1035_v13  ;;  %v179_v47 = vld [vmem:[#allocation5 + $0x398] sm:$0xff]  ;;  %v53_v48 = vld [vmem:[#allocation2] sm:$0xff]  ;;  %v1079_v51 = vpack.c.bf16 %v161_v43, %v160_v41  ;;  %v130_v53 = vld [vmem:[#allocation5 + $0x210] sm:$0xff] }
  0x41   :  { %1038 = vmatprep.subr.bf16.mxu1 %v1037_v18  ;;  %v55_v50 = vld [vmem:[#allocation2 + $0x10] sm:$0xff]  ;;  %v162_v55 = vld [vmem:[#allocation5 + $0x310] sm:$0xff]  ;;  %v1081_v56 = vpack.c.bf16 %v179_v47, %v178_v46  ;;  %v148_v58 = vld [vmem:[#allocation5 + $0x2a0] sm:$0xff] }
  0x42   :  { %1008 = vmatpush3.bf16.msra.mxu0 %v1007_v24  ;;  %v131_v54 = vld [vmem:[#allocation5 + $0x218] sm:$0xff]  ;;  %v149_v59 = vld [vmem:[#allocation5 + $0x2a8] sm:$0xff]  ;;  %v180_v60 = vld [vmem:[#allocation5 + $0x3a0] sm:$0xff] }
  0x43   :  { %1010 = vmatprep.subr.bf16.mxu0 %v1009_v26  ;;  %v163_v57 = vld [vmem:[#allocation5 + $0x318] sm:$0xff]  ;;  %v181_v61 = vld [vmem:[#allocation5 + $0x3a8] sm:$0xff]  ;;  %v1051_v62 = vpack.c.bf16 %v131_v54, %v130_v53  ;;  %v1053_v0 = vpack.c.bf16 %v149_v59, %v148_v58  ;;  %v132_v1 = vld [vmem:[#allocation5 + $0x220] sm:$0xff] }
  0x44   :  { %1040 = vmatpush3.bf16.msra.mxu1 %v1039_v25  ;;  %v1083_v63 = vpack.c.bf16 %v163_v57, %v162_v55  ;;  %v133_v2 = vld [vmem:[#allocation5 + $0x228] sm:$0xff]  ;;  %v164_v3 = vld [vmem:[#allocation5 + $0x320] sm:$0xff]  ;;  %v1085_v4 = vpack.c.bf16 %v181_v61, %v180_v60  ;;  %v150_v6 = vld [vmem:[#allocation5 + $0x2b0] sm:$0xff] }
  0x45   :  { %1042 = vmatprep.subr.bf16.mxu1 %v1041_v30  ;;  %v165_v5 = vld [vmem:[#allocation5 + $0x328] sm:$0xff]  ;;  %v151_v7 = vld [vmem:[#allocation5 + $0x2b8] sm:$0xff]  ;;  %v182_v8 = vld [vmem:[#allocation5 + $0x3b0] sm:$0xff]  ;;  %v1055_v10 = vpack.c.bf16 %v133_v2, %v132_v1 }
  0x46   :  { %1012 = vmatpush3.bf16.msra.mxu0 %v1011_v36  ;;  %v183_v9 = vld [vmem:[#allocation5 + $0x3b8] sm:$0xff]  ;;  %v1087_v11 = vpack.c.bf16 %v165_v5, %v164_v3  ;;  %v1057_v12 = vpack.c.bf16 %v151_v7, %v150_v6  ;;  %v134_v13 = vld [vmem:[#allocation5 + $0x230] sm:$0xff]  ;;  %v152_v18 = vld [vmem:[#allocation5 + $0x2c0] sm:$0xff] }
  0x47   :  { %1046 = vmatprep.subr.bf16.mxu0 %v1045_v38  ;;  %v135_v14 = vld [vmem:[#allocation5 + $0x238] sm:$0xff]  ;;  %v166_v15 = vld [vmem:[#allocation5 + $0x330] sm:$0xff]  ;;  %v1089_v16 = vpack.c.bf16 %v183_v9, %v182_v8  ;;  %v153_v19 = vld [vmem:[#allocation5 + $0x2c8] sm:$0xff] }
  0x48   :  { %1044 = vmatpush3.bf16.msra.mxu1 %v1043_v37  ;;  %v167_v17 = vld [vmem:[#allocation5 + $0x338] sm:$0xff]  ;;  %v184_v20 = vld [vmem:[#allocation5 + $0x3c0] sm:$0xff]  ;;  %v185_v21 = vld [vmem:[#allocation5 + $0x3c8] sm:$0xff]  ;;  %v1059_v23 = vpack.c.bf16 %v135_v14, %v134_v13  ;;  %v1061_v26 = vpack.c.bf16 %v153_v19, %v152_v18 }
  0x49   :  { %1078 = vmatprep.subr.bf16.mxu1 %v1077_v42  ;;  %312 = vmatmul.mubr.f32.vlgmr.msra.gmra.mrb[0].mxu0 %v53_v48  ;;  %v58_v22 = vld [vmem:[#allocation2 + $0x28] sm:$0xff]  ;;  %v136_v24 = vld [vmem:[#allocation5 + $0x240] sm:$0xff]  ;;  %v1091_v25 = vpack.c.bf16 %v167_v17, %v166_v15  ;;  %v137_v27 = vld [vmem:[#allocation5 + $0x248] sm:$0xff]  ;;  %v1093_v30 = vpack.c.bf16 %v185_v21, %v184_v20 }
  0x4a   :  { %1048 = vmatpush3.bf16.msra.mxu0 %v1047_v49  ;;  %451 = vmatprep.mubr.f32.mxu0 %v58_v22  ;;  %v168_v28 = vld [vmem:[#allocation5 + $0x340] sm:$0xff]  ;;  %v169_v31 = vld [vmem:[#allocation5 + $0x348] sm:$0xff]  ;;  %v154_v32 = vld [vmem:[#allocation5 + $0x2d0] sm:$0xff]  ;;  %v1063_v36 = vpack.c.bf16 %v137_v27, %v136_v24 }
  0x4b   :  { %382 = vmatmul.mubr.f32.vlgmr.msra.gmra.mrb[0].mxu1 %v55_v50  ;;  %1050 = vmatprep.subr.bf16.mxu0 %v1049_v52  ;;  %v60_v29 = vld [vmem:[#allocation2 + $0x38] sm:$0xff]  ;;  %v155_v33 = vld [vmem:[#allocation5 + $0x2d8] sm:$0xff]  ;;  %v186_v34 = vld [vmem:[#allocation5 + $0x3d0] sm:$0xff]  ;;  %v1095_v37 = vpack.c.bf16 %v169_v31, %v168_v28 }
  0x4c   :  { %1080 = vmatpush3.bf16.msra.mxu1 %v1079_v51  ;;  %521 = vmatprep.mubr.f32.mxu1 %v60_v29  ;;  %v187_v35 = vld [vmem:[#allocation5 + $0x3d8] sm:$0xff]  ;;  %v1065_v38 = vpack.c.bf16 %v155_v33, %v154_v32  ;;  %v138_v39 = vld [vmem:[#allocation5 + $0x250] sm:$0xff]  ;;  %v156_v44 = vld [vmem:[#allocation5 + $0x2e0] sm:$0xff] }
  0x4d   :  { %1082 = vmatprep.subr.bf16.mxu1 %v1081_v56  ;;  %v139_v40 = vld [vmem:[#allocation5 + $0x258] sm:$0xff]  ;;  %v170_v41 = vld [vmem:[#allocation5 + $0x350] sm:$0xff]  ;;  %v1097_v42 = vpack.c.bf16 %v187_v35, %v186_v34  ;;  %v157_v45 = vld [vmem:[#allocation5 + $0x2e8] sm:$0xff] }
  0x4e   :  { %1052 = vmatpush3.bf16.msra.mxu0 %v1051_v62  ;;  %v171_v43 = vld [vmem:[#allocation5 + $0x358] sm:$0xff]  ;;  %v188_v46 = vld [vmem:[#allocation5 + $0x3e0] sm:$0xff]  ;;  %v189_v47 = vld [vmem:[#allocation5 + $0x3e8] sm:$0xff]  ;;  %v1067_v48 = vpack.c.bf16 %v139_v40, %v138_v39  ;;  %v1069_v50 = vpack.c.bf16 %v157_v45, %v156_v44 }
  0x4f   :  { %1054 = vmatprep.subr.bf16.mxu0 %v1053_v0  ;;  %v1099_v49 = vpack.c.bf16 %v171_v43, %v170_v41  ;;  %v140_v51 = vld [vmem:[#allocation5 + $0x260] sm:$0xff]  ;;  %v141_v52 = vld [vmem:[#allocation5 + $0x268] sm:$0xff]  ;;  %v1101_v54 = vpack.c.bf16 %v189_v47, %v188_v46  ;;  %v158_v56 = vld [vmem:[#allocation5 + $0x2f0] sm:$0xff] }
  0x50   :  { %1084 = vmatpush3.bf16.msra.mxu1 %v1083_v63  ;;  %v172_v53 = vld [vmem:[#allocation5 + $0x360] sm:$0xff]  ;;  %v173_v55 = vld [vmem:[#allocation5 + $0x368] sm:$0xff]  ;;  %v159_v57 = vld [vmem:[#allocation5 + $0x2f8] sm:$0xff]  ;;  %v1071_v60 = vpack.c.bf16 %v141_v52, %v140_v51 }
  0x51   :  { %1086 = vmatprep.subr.bf16.mxu1 %v1085_v4  ;;  %v190_v58 = vld [vmem:[#allocation5 + $0x3f0] sm:$0xff]  ;;  %v191_v59 = vld [vmem:[#allocation5 + $0x3f8] sm:$0xff]  ;;  %v1103_v61 = vpack.c.bf16 %v173_v55, %v172_v53  ;;  %v1073_v62 = vpack.c.bf16 %v159_v57, %v158_v56  ;;  %v208_v4 = vld [vmem:[#allocation5 + $0x480] sm:$0xff] }
  0x52   :  { %1056 = vmatpush3.bf16.msra.mxu0 %v1055_v10  ;;  %v142_v63 = vld [vmem:[#allocation5 + $0x270] sm:$0xff]  ;;  %v143_v0 = vld [vmem:[#allocation5 + $0x278] sm:$0xff]  ;;  %v1105_v2 = vpack.c.bf16 %v191_v59, %v190_v58  ;;  %v209_v5 = vld [vmem:[#allocation5 + $0x488] sm:$0xff] }
  0x53   :  { %1058 = vmatprep.subr.bf16.mxu0 %v1057_v12  ;;  %v174_v1 = vld [vmem:[#allocation5 + $0x370] sm:$0xff]  ;;  %v175_v3 = vld [vmem:[#allocation5 + $0x378] sm:$0xff]  ;;  %v1075_v6 = vpack.c.bf16 %v143_v0, %v142_v63  ;;  %v1109_v8 = vpack.c.bf16 %v209_v5, %v208_v4  ;;  %v192_v9 = vld [vmem:[#allocation5 + $0x400] sm:$0xff] }
  0x54   :  { %1088 = vmatpush3.bf16.msra.mxu1 %v1087_v11  ;;  %v1107_v7 = vpack.c.bf16 %v175_v3, %v174_v1  ;;  %v193_v10 = vld [vmem:[#allocation5 + $0x408] sm:$0xff]  ;;  %v210_v11 = vld [vmem:[#allocation5 + $0x490] sm:$0xff]  ;;  %v211_v12 = vld [vmem:[#allocation5 + $0x498] sm:$0xff] }
  0x55   :  { %1090 = vmatprep.subr.bf16.mxu1 %v1089_v16  ;;  %v224_v13 = vld [vmem:[#allocation5 + $0x500] sm:$0xff]  ;;  %v225_v14 = vld [vmem:[#allocation5 + $0x508] sm:$0xff]  ;;  %v1111_v16 = vpack.c.bf16 %v193_v10, %v192_v9  ;;  %v59_v17 = vld [vmem:[#allocation2 + $0x30] sm:$0xff]  ;;  %v1113_v18 = vpack.c.bf16 %v211_v12, %v210_v11 }
  0x56   :  { %1060 = vmatpush3.bf16.msra.mxu0 %v1059_v23  ;;  %v57_v15 = vld [vmem:[#allocation2 + $0x20] sm:$0xff]  ;;  %v194_v19 = vld [vmem:[#allocation5 + $0x410] sm:$0xff]  ;;  %v195_v20 = vld [vmem:[#allocation5 + $0x418] sm:$0xff]  ;;  %v1142_v21 = vpack.c.bf16 %v225_v14, %v224_v13  ;;  %v1255_v23 = vmov 0.0|0.0  }
  0x57   :  { %1062 = vmatprep.subr.bf16.mxu0 %v1061_v26  ;;  %v212_v22 = vld [vmem:[#allocation5 + $0x4a0] sm:$0xff]  ;;  %v213_v24 = vld [vmem:[#allocation5 + $0x4a8] sm:$0xff]  ;;  %v227_v26 = vld [vmem:[#allocation5 + $0x518] sm:$0xff]  ;;  %v1115_v28 = vpack.c.bf16 %v195_v20, %v194_v19 }
  0x58   :  { %1092 = vmatpush3.bf16.msra.mxu1 %v1091_v25  ;;  %v226_v25 = vld [vmem:[#allocation5 + $0x510] sm:$0xff]  ;;  %v1117_v29 = vpack.c.bf16 %v213_v24, %v212_v22  ;;  %v197_v31 = vld [vmem:[#allocation5 + $0x428] sm:$0xff]  ;;  %v215_v34 = vld [vmem:[#allocation5 + $0x4b8] sm:$0xff] }
  0x59   :  { %1094 = vmatprep.subr.bf16.mxu1 %v1093_v30  ;;  %v62_v27 = vld [vmem:[#allocation2 + $0x48] sm:$0xff]  ;;  %v196_v30 = vld [vmem:[#allocation5 + $0x420] sm:$0xff]  ;;  %v1145_v32 = vpack.c.bf16 %v227_v26, %v226_v25  ;;  %v199_v41 = vld [vmem:[#allocation5 + $0x438] sm:$0xff] }
  0x5a   :  { %1064 = vmatpush3.bf16.msra.mxu0 %v1063_v36  ;;  %v214_v33 = vld [vmem:[#allocation5 + $0x4b0] sm:$0xff]  ;;  %v228_v35 = vld [vmem:[#allocation5 + $0x520] sm:$0xff]  ;;  %v229_v36 = vld [vmem:[#allocation5 + $0x528] sm:$0xff] }
  0x5b   :  { %1066 = vmatprep.subr.bf16.mxu0 %v1065_v38  ;;  %v1119_v38 = vpack.c.bf16 %v197_v31, %v196_v30  ;;  %v1121_v39 = vpack.c.bf16 %v215_v34, %v214_v33  ;;  %v198_v40 = vld [vmem:[#allocation5 + $0x430] sm:$0xff]  ;;  %v216_v43 = vld [vmem:[#allocation5 + $0x4c0] sm:$0xff]  ;;  %v217_v44 = vld [vmem:[#allocation5 + $0x4c8] sm:$0xff] }
  0x5c   :  { %1096 = vmatpush3.bf16.msra.mxu1 %v1095_v37  ;;  %v1257_v37 = vmov 0.0   ;;  %v230_v45 = vld [vmem:[#allocation5 + $0x530] sm:$0xff]  ;;  %v231_v46 = vld [vmem:[#allocation5 + $0x538] sm:$0xff]  ;;  %v1123_v47 = vpack.c.bf16 %v199_v41, %v198_v40  ;;  %v233_v55 = vld [vmem:[#allocation5 + $0x548] sm:$0xff] }
  0x5d   :  { %1098 = vmatprep.subr.bf16.mxu1 %v1097_v42  ;;  %v1148_v42 = vpack.c.bf16 %v229_v36, %v228_v35  ;;  %v1151_v51 = vpack.c.bf16 %v231_v46, %v230_v45  ;;  %v218_v52 = vld [vmem:[#allocation5 + $0x4d0] sm:$0xff]  ;;  %v219_v53 = vld [vmem:[#allocation5 + $0x4d8] sm:$0xff]  ;;  %v204_v3 = vld [vmem:[#allocation5 + $0x460] sm:$0xff] }
  0x5e   :  { %1068 = vmatpush3.bf16.msra.mxu0 %v1067_v48  ;;  %v1125_v48 = vpack.c.bf16 %v217_v44, %v216_v43  ;;  %v1129_v57 = vpack.c.bf16 %v219_v53, %v218_v52  ;;  %v202_v58 = vld [vmem:[#allocation5 + $0x450] sm:$0xff]  ;;  %v203_v59 = vld [vmem:[#allocation5 + $0x458] sm:$0xff]  ;;  %v205_v4 = vld [vmem:[#allocation5 + $0x468] sm:$0xff] }
  0x5f   :  { %1070 = vmatprep.subr.bf16.mxu0 %v1069_v50  ;;  %v201_v50 = vld [vmem:[#allocation5 + $0x448] sm:$0xff]  ;;  %v234_v63 = vld [vmem:[#allocation5 + $0x550] sm:$0xff]  ;;  %v235_v0 = vld [vmem:[#allocation5 + $0x558] sm:$0xff]  ;;  %v1131_v1 = vpack.c.bf16 %v203_v59, %v202_v58  ;;  %v1135_v10 = vpack.c.bf16 %v205_v4, %v204_v3 }
  0x60   :  { %1100 = vmatpush3.bf16.msra.mxu1 %v1099_v49  ;;  %v200_v49 = vld [vmem:[#allocation5 + $0x440] sm:$0xff]  ;;  %v1157_v5 = vpack.c.bf16 %v235_v0, %v234_v63  ;;  %v237_v9 = vld [vmem:[#allocation5 + $0x568] sm:$0xff]  ;;  %v206_v12 = vld [vmem:[#allocation5 + $0x470] sm:$0xff] }
  0x61   :  { %1102 = vmatprep.subr.bf16.mxu1 %v1101_v54  ;;  %v232_v54 = vld [vmem:[#allocation5 + $0x540] sm:$0xff]  ;;  %v1127_v56 = vpack.c.bf16 %v201_v50, %v200_v49  ;;  %v207_v13 = vld [vmem:[#allocation5 + $0x478] sm:$0xff]  ;;  %v61_v19 = vld [vmem:[#allocation2 + $0x40] sm:$0xff]  ;;  %v676_v49 = vlaneseq }
  0x62   :  { %1072 = vmatpush3.bf16.msra.mxu0 %v1071_v60  ;;  %v1154_v60 = vpack.c.bf16 %v233_v55, %v232_v54  ;;  %v63_v20 = vld [vmem:[#allocation2 + $0x50] sm:$0xff]  ;;  %v751_v24 = vld [vmem:[%s1369_s2] ss:$0 sm:$0xff] }
  0x63   :  { %1074 = vmatprep.subr.bf16.mxu0 %v1073_v62  ;;  %v221_v62 = vld [vmem:[#allocation5 + $0x4e8] sm:$0xff]  ;;  %v677_v50 = vshrl.u32 %v676_v49, 7 }
  0x64   :  { %1104 = vmatpush3.bf16.msra.mxu1 %v1103_v61  ;;  %v220_v61 = vld [vmem:[#allocation5 + $0x4e0] sm:$0xff]  ;;  %v670_v53 = vld [vmem:[%s1370_s3] sm:$0xff] }
  0x65   :  { %1106 = vmatprep.subr.bf16.mxu1 %v1105_v2  ;;  %v1133_v2 = vpack.c.bf16 %v221_v62, %v220_v61  ;;  %v687_v52 = vsub.s32 1, %v677_v50 }
  0x66   :  { %1076 = vmatpush3.bf16.msra.mxu0 %v1075_v6  ;;  %v222_v6 = vld [vmem:[#allocation5 + $0x4f0] sm:$0xff] }
  0x67   :  { %1110 = vmatprep.subr.bf16.mxu0 %v1109_v8  ;;  %v236_v8 = vld [vmem:[#allocation5 + $0x560] sm:$0xff] }
  0x68   :  { %1108 = vmatpush3.bf16.msra.mxu1 %v1107_v7  ;;  %v223_v7 = vld [vmem:[#allocation5 + $0x4f8] sm:$0xff]  ;;  %v1160_v14 = vpack.c.bf16 %v237_v9, %v236_v8  ;;  %v753_v8 = vld [vmem:[%s1373_s6] ss:$0 sm:$0xff] }
  0x69   :  { %1141 = vmatprep.subr.bf16.mxu1 %v1255_v23  ;;  %452 = vmatmul.mubr.f32.vlgmr.msra.gmra.mrb[2].mxu0 %v57_v15  ;;  %v1137_v11 = vpack.c.bf16 %v223_v7, %v222_v6  ;;  %v238_v15 = vld [vmem:[#allocation5 + $0x570] sm:$0xff] }
  0x6a   :  { %1112 = vmatpush3.bf16.msra.mxu0 %v1111_v16  ;;  %591 = vmatprep.mubr.f32.mxu0 %v62_v27  ;;  %v239_v16 = vld [vmem:[#allocation5 + $0x578] sm:$0xff] }
  0x6b   :  { %522 = vmatmul.mubr.f32.vlgmr.msra.gmra.mrb[2].mxu1 %v59_v17  ;;  %1114 = vmatprep.subr.bf16.mxu0 %v1113_v18  ;;  %v1139_v17 = vpack.c.bf16 %v207_v13, %v206_v12  ;;  %v1163_v18 = vpack.c.bf16 %v239_v16, %v238_v15 }
  0x6c   :  { %1143 = vmatpush3.bf16.msra.mxu1 %v1142_v21  ;;  %978 = vmatprep.mubr.msk.f32.mxu1 %vm1256_vm0, %v1257_v37  ;;  %v1258_v21 = vmov 0  }
  0x6d   :  { %1144 = vmatprep.subr.bf16.mxu1 %v1255_v23  ;;  %1175 = vset.pattern.permute.xlu0 %v1258_v21 }
  0x6e   :  { %1116 = vmatpush3.bf16.msra.mxu0 %v1115_v28  ;;  %1177 = vset.pattern.permute.xlu1 %v1258_v21 }
  0x6f   :  { %1118 = vmatprep.subr.bf16.mxu0 %v1117_v29 }
  0x70   :  { %1146 = vmatpush3.bf16.msra.mxu1 %v1145_v32 }
  0x71   :  { %1147 = vmatprep.subr.bf16.mxu1 %v1255_v23 }
  0x72   :  { %1120 = vmatpush3.bf16.msra.mxu0 %v1119_v38 }
  0x73   :  { %1122 = vmatprep.subr.bf16.mxu0 %v1121_v39 }
  0x74   :  { %1149 = vmatpush3.bf16.msra.mxu1 %v1148_v42 }
  0x75   :  { %1150 = vmatprep.subr.bf16.mxu1 %v1255_v23 }
  0x76   :  { %1124 = vmatpush3.bf16.msra.mxu0 %v1123_v47 }
  0x77   :  { %1126 = vmatprep.subr.bf16.mxu0 %v1125_v48  ;;  %v1259_v48 = vmov 1  }
  0x78   :  { %1152 = vmatpush3.bf16.msra.mxu1 %v1151_v51  ;;  %v678_v51 = vsub.s32 0, %v677_v50 }
  0x79   :  { %1153 = vmatprep.subr.bf16.mxu1 %v1255_v23 }
  0x7a   :  { %1128 = vmatpush3.bf16.msra.mxu0 %v1127_v56  ;;  %v679_v55 = vrot.slane %v670_v53, %v678_v51  ;;  %v688_v56 = vrot.slane %v670_v53, %v687_v52 }
  0x7b   :  { %1130 = vmatprep.subr.bf16.mxu0 %v1129_v57 }
  0x7c   :  { %1155 = vmatpush3.bf16.msra.mxu1 %v1154_v60  ;;  %v752_v60 = vld [vmem:[%s1371_s4] ss:$0 sm:$0xff] }
  0x7d   :  { %1156 = vmatprep.subr.bf16.mxu1 %v1255_v23 }
  0x7e   :  { %1132 = vmatpush3.bf16.msra.mxu0 %v1131_v1  ;;  %v702_v1 = vld [vmem:[%s1372_s5] sm:$0xff]  ;;  %s1223_s5 = scalar_lea.vmem %s742_s10, 128 }
  0x7f   :  { %1134 = vmatprep.subr.bf16.mxu0 %v1133_v2  ;;  %v711_v3 = vrot.slane %v702_v1, %v678_v51  ;;  %v720_v4 = vrot.slane %v702_v1, %v687_v52  ;;  %p1224_p2 = scmp.ne.s32.totalorder %s742_s10, %s1223_s5  ;;  %p1229_p4 = scmp.lt.s32.totalorder %s1223_s5, %s1223_s5 }
  0x80   :  { %1158 = vmatpush3.bf16.msra.mxu1 %v1157_v5 }
  0x81   :  { %1159 = vmatprep.subr.bf16.mxu1 %v1255_v23  ;;  %p1230_p5 = por %p1229_p4, %p1228_p3 }
  0x82   :  { %1136 = vmatpush3.bf16.msra.mxu0 %v1135_v10 }
  0x83   :  { %1138 = vmatprep.subr.bf16.mxu0 %v1137_v11  ;;  %p1231_p6 = pnand %p1230_p5, %p1224_p2 }
  0x84   :  { %1161 = vmatpush3.bf16.msra.mxu1 %v1160_v14 }
  0x85   :  { %1162 = vmatprep.subr.bf16.mxu1 %v1255_v23 }
  0x86   :  { %1140 = vmatpush3.bf16.msra.mxu0 %v1139_v17 }
  0x88   :  { %1164 = vmatpush3.bf16.msra.mxu1 %v1163_v18 }
  0x89   :  { %592 = vmatmul.mubr.f32.vlgmr.msra.gmra.mrb[4].mxu0 %v61_v19 }
  0x8b   :  { %979 = vmatmul.mubr.f32.vlgmr.msra.gmra.mrb[4].mxu1 %v63_v20 }
 0x11c   :  { %v786_v22 = vpop.f32.mrb[0].mxu0 }
 0x11d   :  { %v787_v25 = vpop.f32.mrb[1].mxu0 }
 0x11e   :  { %v821_v26 = vpop.f32.mrb[0].mxu1  ;;  %v788_v27 = vadd.f32 %v787_v25, %v786_v22 }
 0x11f   :  { %v822_v28 = vpop.f32.mrb[1].mxu1 }
 0x120   :  { %v823_v29 = vadd.f32 %v822_v28, %v821_v26  ;;  %v314_v23 = vadd.f32 %v788_v27, %v751_v24 }
 0x122   :  { %v384_v30 = vadd.f32 %v823_v29, %v314_v23 }
 0x13c   :  { %v856_v31 = vpop.f32.mrb[2].mxu0 }
 0x13d   :  { %v857_v32 = vpop.f32.mrb[3].mxu0 }
 0x13e   :  { %v891_v33 = vpop.f32.mrb[2].mxu1  ;;  %v858_v34 = vadd.f32 %v857_v32, %v856_v31 }
 0x13f   :  { %v892_v35 = vpop.f32.mrb[3].mxu1 }
 0x140   :  { %v893_v36 = vadd.f32 %v892_v35, %v891_v33  ;;  %v454_v37 = vadd.f32 %v858_v34, %v384_v30 }
 0x142   :  { %v524_v38 = vadd.f32 %v893_v36, %v454_v37 }
 0x15c   :  { %v926_v39 = vpop.f32.mrb[4].mxu0 }
 0x15d   :  { %v927_v40 = vpop.f32.mrb[5].mxu0 }
 0x15e   :  { %v663_v41 = vpop.f32.mrb[4].mxu1  ;;  %v928_v42 = vadd.f32 %v927_v40, %v926_v39 }
 0x15f   :  { %v980_v43 = vpop.f32.mrb[5].mxu1 }
 0x160   :  { %v594_v44 = vadd.f32 %v928_v42, %v524_v38 }
 0x162   :  { %v664_v45 = vadd.f32 %v663_v41, %v594_v44 }
 0x164   :  { %vm667_vm1 = vcmp.gt.f32.partialorder %v664_v45, 0.0  ;;  %v668_v46 = vmul.f32 0.01, %v664_v45 }
 0x166   :  { %v669_v47 = vsel %vm667_vm1, %v664_v45, %v668_v46 }
 0x167   :  { %673 = vperm.xlu0 %1175, %v669_v47  }
 0x16b   :  { %1176 = vset.pattern.permute.xlu0 %v1259_v48 }
 0x16c   :  { %682 = vperm.xlu0 %1176, %v669_v47  }
 0x1e6   :  { %v674_v54 = vpop.permute.xlu0 %673 }
 0x1e7   :  { %v680_v58 = vmul.f32 %v679_v55, %v674_v54 }
 0x1eb   :  { %v683_v57 = vpop.permute.xlu0 %682 }
 0x1ec   :  { %v689_v59 = vmul.f32 %v688_v56, %v683_v57 }
 0x1ee   :  { %v690_v61 = vadd.f32 %v689_v59, %v680_v58 }
 0x1f0   :  { %v698_v62 = vadd.f32 %v752_v60, %v690_v61 }
 0x1f2   :  { %vm699_vm2 = vcmp.gt.f32.partialorder %v698_v62, 0.0  ;;  %v700_v63 = vmul.f32 0.01, %v698_v62 }
 0x1f4   :  { %v701_v0 = vsel %vm699_vm2, %v698_v62, %v700_v63 }
 0x1f5   :  { %705 = vperm.xlu1 %1177, %v701_v0  }
 0x1f9   :  { %1178 = vset.pattern.permute.xlu1 %v1259_v48 }
 0x1fa   :  { %714 = vperm.xlu1 %1178, %v701_v0  }
 0x274   :  { %v706_v2 = vpop.permute.xlu1 %705 }
 0x275   :  { %v712_v6 = vmul.f32 %v711_v3, %v706_v2 }
 0x279   :  { %v715_v5 = vpop.permute.xlu1 %714 }
 0x27a   :  { %v721_v7 = vmul.f32 %v720_v4, %v715_v5 }
 0x27c   :  { %v722_v9 = vadd.f32 %v721_v7, %v712_v6 }
 0x27e   :  { %v730_v10 = vadd.f32 %v753_v8, %v722_v9 }
 0x280   :  { %vm731_vm3 = vcmp.gt.f32.partialorder %v730_v10, 0.0  ;;  %v732_v11 = vmul.f32 0.01, %v730_v10 }
 0x282   :  { %v733_v12 = vsel %vm731_vm3, %v730_v10, %v732_v11 }
 0x283   :  { %734 = vst [vmem:[#allocation7] sm:$0xff] %v733_v12 }
 0x284   :  { %1234 = shalt.err (!%p1231_p6)
}
 0x285   :  { %s1235_s6 = scalar_lea.hbm %s1374_s7, 128 }
 0x286   :  { %p1236_p7 = scmp.ne.s32.totalorder %s1374_s7, %s1235_s6  ;;  %p1239_p8 = scmp.lt.u32.totalorder %s1235_s6, %s1374_s7 }
 0x288   :  { %p1241_p9 = pnand %p1239_p8, %p1236_p7 }
 0x28a   :  { %1244 = shalt.err (!%p1241_p9)
}
 0x28b   :  { %744 = dma.vmem_to_hbm [thread:$0]  %s742_s10, 128, %s1374_s7, [#allocation4]  }
 0x28c   :  { %1249 = dma.done.wait [#allocation4], 128  }
 0x28d   :  { %1250 = vsyncadd [#allocation4], 4294967168 }
 0x28e   :  { %748 = vsyncpa [#allocation3], 1 }
 0x28f   :  { %749 = vsyncpa [#allocation6], 1 }
 0x290   :  { %750 = vsyncpa [#allocation4], 1 }

</bundles_post_ra>
